<compile_context>
chip_gen: v6e
topology: v6e:2x2x1
jax: 0.10.0
libtpu: 0.0.40
codegen_flags: <defaults>
</compile_context>

<pallas_src>
import jax
import jax.numpy as jnp
from jax.experimental import pallas as pl
from jax.experimental.pallas import tpu as pltpu

# Deterministic "quantizer" config (module __init__ stores n_bits and factor).
N_BITS = 8
FACTOR = 0.95
QMAX = float(2 ** N_BITS - 1)


def _choose_tiling(n):
    """Pick a lane-dense slab width W and row tile TR (block ~<= 2 MiB f32)."""
    W = 512
    while W > 128 and W * 8 > n:        # shrink width for tiny tensors
        W //= 2
    TR = 1024                            # 1024 x 512 x 4B = 2 MiB per block
    while TR > 8 and TR * W > n:         # shrink row tile for small tensors
        TR //= 2
    return W, TR


def _minmax_kernel(x_ref, min_ref, max_ref, vmin, vmax):
    """Grid-sequential global min/max.

    Per step: elementwise (VPU) accumulation into (1, W) scratch.
    Last step: single cross-lane reduce to the (1, 1) outputs.
    """
    i = pl.program_id(0)

    @pl.when(i == 0)
    def _():
        vmin[...] = jnp.full(vmin.shape, jnp.inf, jnp.float32)
        vmax[...] = jnp.full(vmax.shape, -jnp.inf, jnp.float32)

    x = x_ref[...].astype(jnp.float32)          # compute in f32 (v5e: no bf16 VPU)
    vmin[...] = jnp.minimum(vmin[...], jnp.min(x, axis=0, keepdims=True))
    vmax[...] = jnp.maximum(vmax[...], jnp.max(x, axis=0, keepdims=True))

    @pl.when(i == pl.num_programs(0) - 1)
    def _():
        min_ref[...] = jnp.min(vmin[...], keepdims=True)
        max_ref[...] = jnp.max(vmax[...], keepdims=True)


def _fakequant_kernel(params_ref, x_ref, y_ref):
    """Elementwise fake-quantize; scale / inv_scale / zp precomputed in SMEM."""
    scale = params_ref[0]
    inv_scale = params_ref[1]
    zp = params_ref[2]

    x = x_ref[...].astype(jnp.float32)
    q = jnp.clip(jnp.round(x * inv_scale + zp), 0.0, QMAX)
    y_ref[...] = ((q - zp) * scale).astype(y_ref.dtype)


def dym_activation_fake_quantize(x):
    orig_shape = x.shape
    orig_dtype = x.dtype
    n = x.size

    W, TR = _choose_tiling(n)
    blk = TR * W
    pad_n = -(-n // blk) * blk
    flat = x.reshape(-1)
    if pad_n != n:
        # Edge padding replicates an existing value -> global min/max unchanged.
        flat = jnp.pad(flat, (0, pad_n - n), mode="edge")
    R = pad_n // W
    x2 = flat.reshape(R, W)                      # native dtype end-to-end
    grid = (R // TR,)

    # ---- Pass 1: global min / max (sequential reduction over the grid) ----
    # TODO(synk): on v7x, split this reduction over the 2 TensorCores
    # (leading size-2 "parallel" axis with per-core partial min/max) for ~2x.
    mn, mx = pl.pallas_call(
        _minmax_kernel,
        out_shape=(jax.ShapeDtypeStruct((1, 1), jnp.float32),
                   jax.ShapeDtypeStruct((1, 1), jnp.float32)),
        grid=grid,
        in_specs=[pl.BlockSpec((TR, W), lambda i: (i, 0))],
        out_specs=(pl.BlockSpec((1, 1), lambda i: (0, 0)),
                   pl.BlockSpec((1, 1), lambda i: (0, 0))),
        scratch_shapes=[pltpu.VMEM((1, W), jnp.float32),
                        pltpu.VMEM((1, W), jnp.float32)],
        compiler_params=pltpu.CompilerParams(dimension_semantics=("arbitrary",)),
    )(x2)

    # ---- Tiny scalar epilogue: derive quant params once (not per tile) ----
    min_range = FACTOR * mn[0, 0]
    max_range = FACTOR * mx[0, 0]
    scale = (max_range - min_range) / QMAX
    # TODO(synk): PyTorch module divides by scale unguarded; a constant tensor
    # (max == min) yields inf/nan here exactly as it would in the reference.
    zp = jnp.round(min_range / scale)            # round-half-to-even, same as torch.round
    zp = jnp.where(min_range < 0, -zp, zp)       # sign flip exactly as in the module
    inv_scale = 1.0 / scale
    params = jnp.stack([scale, inv_scale, zp]).astype(jnp.float32)

    # ---- Pass 2: elementwise fake quantization (fully parallel) ----
    y2 = pl.pallas_call(
        _fakequant_kernel,
        out_shape=jax.ShapeDtypeStruct((R, W), orig_dtype),
        grid=grid,
        in_specs=[pl.BlockSpec(memory_space=pltpu.SMEM),
                  pl.BlockSpec((TR, W), lambda i: (i, 0))],
        out_specs=pl.BlockSpec((TR, W), lambda i: (i, 0)),
        compiler_params=pltpu.CompilerParams(dimension_semantics=("parallel",)),
    )(params, x2)

    return y2.reshape(-1)[:n].reshape(orig_shape)


if __name__ == "__main__":
    key = jax.random.PRNGKey(0)
    x = jax.random.normal(key, (2, 4, 16, 16), dtype=jnp.float32)  # NCHW

    fn = jax.jit(dym_activation_fake_quantize)
    y = jax.block_until_ready(fn(x))

    # Pure-JAX reference (same formula as the PyTorch module).
    mn = FACTOR * x.min()
    mx = FACTOR * x.max()
    scale = (mx - mn) / QMAX
    zp = jnp.round(mn / scale)
    zp = jnp.where(mn < 0, -zp, zp)
    ref = (jnp.clip(jnp.round(x / scale + zp), 0.0, QMAX) - zp) * scale

    assert y.shape == x.shape and y.dtype == x.dtype
    assert jnp.allclose(y, ref, atol=1e-5, rtol=1e-5), "mismatch vs reference"
    print("KERNEL_OK")
</pallas_src>

<mosaic_0001>
module attributes {stable_mosaic.version = 11 : i64} {
  func.func @_minmax_kernel(%arg0: i32, %arg1: memref<8x256xf32, #tpu.memory_space<vmem>>, %arg2: memref<1x1xf32, #tpu.memory_space<vmem>>, %arg3: memref<1x1xf32, #tpu.memory_space<vmem>>, %arg4: memref<1x256xf32, #tpu.memory_space<vmem>>, %arg5: memref<1x256xf32, #tpu.memory_space<vmem>>) attributes {dimension_semantics = [#tpu.dimension_semantics<arbitrary>], iteration_bounds = array<i64: 1>, scalar_prefetch = 0 : i64, scratch_operands = 2 : i64, tpu.core_type = #tpu.core_type<tc>, window_params = [{transform_indices = @transform_0, window_bounds = array<i64: 8, 256>}, {pipeline_mode = #tpu.pipeline_mode<synchronous>, transform_indices = @transform_1, window_bounds = array<i64: 1, 1>}, {pipeline_mode = #tpu.pipeline_mode<synchronous>, transform_indices = @transform_2, window_bounds = array<i64: 1, 1>}]} {
    %c0_i32 = arith.constant 0 : i32
    %0 = arith.cmpi eq, %arg0, %c0_i32 : i32
    %1 = arith.extui %0 : i1 to i32
    %c0_i32_0 = arith.constant 0 : i32
    %2 = arith.cmpi ne, %1, %c0_i32_0 : i32
    scf.if %2 {
      %cst_13 = arith.constant 0x7F800000 : f32
      %17 = vector.broadcast %cst_13 : f32 to vector<1x256xf32>
      %c0_14 = arith.constant 0 : index
      %c0_15 = arith.constant 0 : index
      %18 = vector.load %arg4[%c0_14, %c0_15] : memref<1x256xf32, #tpu.memory_space<vmem>>, vector<1x256xf32>
      tpu.vector_store %arg4[%c0_14, %c0_15], %17 {strides = array<i32>} : memref<1x256xf32, #tpu.memory_space<vmem>>, vector<1x256xf32>,
      %cst_16 = arith.constant 0xFF800000 : f32
      %19 = vector.broadcast %cst_16 : f32 to vector<1x256xf32>
      %c0_17 = arith.constant 0 : index
      %c0_18 = arith.constant 0 : index
      %20 = vector.load %arg5[%c0_17, %c0_18] : memref<1x256xf32, #tpu.memory_space<vmem>>, vector<1x256xf32>
      tpu.vector_store %arg5[%c0_17, %c0_18], %19 {strides = array<i32>} : memref<1x256xf32, #tpu.memory_space<vmem>>, vector<1x256xf32>,
    } else {
    }
    %c0 = arith.constant 0 : index
    %c0_1 = arith.constant 0 : index
    %3 = vector.load %arg1[%c0, %c0_1] : memref<8x256xf32, #tpu.memory_space<vmem>>, vector<8x256xf32>
    %c0_2 = arith.constant 0 : index
    %c0_3 = arith.constant 0 : index
    %4 = vector.load %arg4[%c0_2, %c0_3] : memref<1x256xf32, #tpu.memory_space<vmem>>, vector<1x256xf32>
    %cst = arith.constant dense<0x7F800000> : vector<256xf32>
    %5 = vector.multi_reduction <minimumf>, %3, %cst [0] : vector<8x256xf32> to vector<256xf32>
    %6 = vector.shape_cast %5 : vector<256xf32> to vector<1x256xf32>
    %7 = arith.minimumf %4, %6 : vector<1x256xf32>
    %c0_4 = arith.constant 0 : index
    %c0_5 = arith.constant 0 : index
    %8 = vector.load %arg4[%c0_4, %c0_5] : memref<1x256xf32, #tpu.memory_space<vmem>>, vector<1x256xf32>
    tpu.vector_store %arg4[%c0_4, %c0_5], %7 {strides = array<i32>} : memref<1x256xf32, #tpu.memory_space<vmem>>, vector<1x256xf32>,
    %c0_6 = arith.constant 0 : index
    %c0_7 = arith.constant 0 : index
    %9 = vector.load %arg5[%c0_6, %c0_7] : memref<1x256xf32, #tpu.memory_space<vmem>>, vector<1x256xf32>
    %cst_8 = arith.constant dense<0xFF800000> : vector<256xf32>
    %10 = vector.multi_reduction <maximumf>, %3, %cst_8 [0] : vector<8x256xf32> to vector<256xf32>
    %11 = vector.shape_cast %10 : vector<256xf32> to vector<1x256xf32>
    %12 = arith.maximumf %9, %11 : vector<1x256xf32>
    %c0_9 = arith.constant 0 : index
    %c0_10 = arith.constant 0 : index
    %13 = vector.load %arg5[%c0_9, %c0_10] : memref<1x256xf32, #tpu.memory_space<vmem>>, vector<1x256xf32>
    tpu.vector_store %arg5[%c0_9, %c0_10], %12 {strides = array<i32>} : memref<1x256xf32, #tpu.memory_space<vmem>>, vector<1x256xf32>,
    %c0_i32_11 = arith.constant 0 : i32
    %14 = arith.cmpi eq, %arg0, %c0_i32_11 : i32
    %15 = arith.extui %14 : i1 to i32
    %c0_i32_12 = arith.constant 0 : i32
    %16 = arith.cmpi ne, %15, %c0_i32_12 : i32
    scf.if %16 {
      %c0_13 = arith.constant 0 : index
      %c0_14 = arith.constant 0 : index
      %17 = vector.load %arg4[%c0_13, %c0_14] : memref<1x256xf32, #tpu.memory_space<vmem>>, vector<1x256xf32>
      %18 = vector.shape_cast %17 : vector<1x256xf32> to vector<1x1x256xf32>
      %cst_15 = arith.constant dense<0x7F800000> : vector<1xf32>
      %19 = vector.multi_reduction <minimumf>, %18, %cst_15 [1, 2] : vector<1x1x256xf32> to vector<1xf32>
      %20 = vector.shape_cast %19 : vector<1xf32> to vector<1x1x1xf32>
      %21 = vector.extract %20[0, 0, 0] : f32 from vector<1x1x1xf32>
      %22 = vector.broadcast %21 : f32 to vector<1x1xf32>
      %c0_16 = arith.constant 0 : index
      %c0_17 = arith.constant 0 : index
      %23 = vector.load %arg2[%c0_16, %c0_17] : memref<1x1xf32, #tpu.memory_space<vmem>>, vector<1x1xf32>
      tpu.vector_store %arg2[%c0_16, %c0_17], %22 {strides = array<i32>} : memref<1x1xf32, #tpu.memory_space<vmem>>, vector<1x1xf32>,
      %c0_18 = arith.constant 0 : index
      %c0_19 = arith.constant 0 : index
      %24 = vector.load %arg5[%c0_18, %c0_19] : memref<1x256xf32, #tpu.memory_space<vmem>>, vector<1x256xf32>
      %25 = vector.shape_cast %24 : vector<1x256xf32> to vector<1x1x256xf32>
      %cst_20 = arith.constant dense<0xFF800000> : vector<1xf32>
      %26 = vector.multi_reduction <maximumf>, %25, %cst_20 [1, 2] : vector<1x1x256xf32> to vector<1xf32>
      %27 = vector.shape_cast %26 : vector<1xf32> to vector<1x1x1xf32>
      %28 = vector.extract %27[0, 0, 0] : f32 from vector<1x1x1xf32>
      %29 = vector.broadcast %28 : f32 to vector<1x1xf32>
      %c0_21 = arith.constant 0 : index
      %c0_22 = arith.constant 0 : index
      %30 = vector.load %arg3[%c0_21, %c0_22] : memref<1x1xf32, #tpu.memory_space<vmem>>, vector<1x1xf32>
      tpu.vector_store %arg3[%c0_21, %c0_22], %29 {strides = array<i32>} : memref<1x1xf32, #tpu.memory_space<vmem>>, vector<1x1xf32>,
    } else {
    }
    return
  }
  func.func @transform_0(%arg0: i32) -> (i32, i32) {
    %c0_i32 = arith.constant 0 : i32
    %c0_i32_0 = arith.constant 0 : i32
    return %arg0, %c0_i32 : i32, i32
  }
  func.func @transform_1(%arg0: i32) -> (i32, i32) {
    %c0_i32 = arith.constant 0 : i32
    %c0_i32_0 = arith.constant 0 : i32
    %c0_i32_1 = arith.constant 0 : i32
    return %c0_i32, %c0_i32_0 : i32, i32
  }
  func.func @transform_2(%arg0: i32) -> (i32, i32) {
    %c0_i32 = arith.constant 0 : i32
    %c0_i32_0 = arith.constant 0 : i32
    %c0_i32_1 = arith.constant 0 : i32
    return %c0_i32, %c0_i32_0 : i32, i32
  }
}

module attributes {stable_mosaic.version = 11 : i64} {
  func.func @_fakequant_kernel(%arg0: i32, %arg1: memref<3xf32, #tpu.memory_space<smem>>, %arg2: memref<8x256xf32, #tpu.memory_space<vmem>>, %arg3: memref<8x256xf32, #tpu.memory_space<vmem>>) attributes {dimension_semantics = [#tpu.dimension_semantics<parallel>], iteration_bounds = array<i64: 1>, scalar_prefetch = 0 : i64, scratch_operands = 0 : i64, tpu.core_type = #tpu.core_type<tc>, window_params = [{transform_indices = @transform_0, window_bounds = array<i64: 3>}, {transform_indices = @transform_1, window_bounds = array<i64: 8, 256>}, {transform_indices = @transform_2, window_bounds = array<i64: 8, 256>}]} {
    %c0 = arith.constant 0 : index
    %0 = memref.load %arg1[%c0] : memref<3xf32, #tpu.memory_space<smem>>
    %c1 = arith.constant 1 : index
    %1 = memref.load %arg1[%c1] : memref<3xf32, #tpu.memory_space<smem>>
    %c2 = arith.constant 2 : index
    %2 = memref.load %arg1[%c2] : memref<3xf32, #tpu.memory_space<smem>>
    %c0_0 = arith.constant 0 : index
    %c0_1 = arith.constant 0 : index
    %3 = vector.load %arg2[%c0_0, %c0_1] : memref<8x256xf32, #tpu.memory_space<vmem>>, vector<8x256xf32>
    %4 = vector.broadcast %1 : f32 to vector<8x256xf32>
    %5 = arith.mulf %3, %4 : vector<8x256xf32>
    %6 = vector.broadcast %2 : f32 to vector<8x256xf32>
    %7 = arith.addf %5, %6 : vector<8x256xf32>
    %8 = math.roundeven %7 : vector<8x256xf32>
    %cst = arith.constant 0.000000e+00 : f32
    %cst_2 = arith.constant 2.550000e+02 : f32
    %9 = vector.broadcast %cst : f32 to vector<8x256xf32>
    %10 = arith.maximumf %9, %8 : vector<8x256xf32>
    %11 = vector.broadcast %cst_2 : f32 to vector<8x256xf32>
    %12 = arith.minimumf %11, %10 : vector<8x256xf32>
    %13 = vector.broadcast %2 : f32 to vector<8x256xf32>
    %14 = arith.subf %12, %13 : vector<8x256xf32>
    %15 = vector.broadcast %0 : f32 to vector<8x256xf32>
    %16 = arith.mulf %14, %15 : vector<8x256xf32>
    %c0_3 = arith.constant 0 : index
    %c0_4 = arith.constant 0 : index
    %17 = vector.load %arg3[%c0_3, %c0_4] : memref<8x256xf32, #tpu.memory_space<vmem>>, vector<8x256xf32>
    tpu.vector_store %arg3[%c0_3, %c0_4], %16 {strides = array<i32>} : memref<8x256xf32, #tpu.memory_space<vmem>>, vector<8x256xf32>,
    return
  }
  func.func @transform_0(%arg0: i32) -> i32 {
    %c0_i32 = arith.constant 0 : i32
    %c0_i32_0 = arith.constant 0 : i32
    return %c0_i32 : i32
  }
  func.func @transform_1(%arg0: i32) -> (i32, i32) {
    %c0_i32 = arith.constant 0 : i32
    %c0_i32_0 = arith.constant 0 : i32
    return %arg0, %c0_i32 : i32, i32
  }
  func.func @transform_2(%arg0: i32) -> (i32, i32) {
    %c0_i32 = arith.constant 0 : i32
    %c0_i32_0 = arith.constant 0 : i32
    return %arg0, %c0_i32 : i32, i32
  }
}

</mosaic_0001>

<bundles_post_ra>
// kernel: dym_activation_fake_quantize.2
= control target key start
LH: loop header
LB: loop body
LE: loop exit
PB: predicated region body
PF: predicated region fallthrough
CT: control target
= control target key end

     0   :  { %8 = vsyncpa [#allocation5], 0  ;;  %v16_v0 = vlaneseq  ;;  %s278_s0 = inlined_call_operand.vmem [shape: f32[8,256], index: 0, kind: input, shape index: {}]   ;;  %s279_s1 = inlined_call_operand.hbm [shape: f32[1,1], index: 1, kind: output, shape index: {0}]   ;;  %s280_s2 = inlined_call_operand.hbm [shape: f32[1,1], index: 2, kind: output, shape index: {1}]  }
   0x1   :  { %v22_v1 = vld [vmem:[%s278_s0] sm:$0xff]  ;;  %v23_v2 = vld [vmem:[%s278_s0 + $0x8] sm:$0xff] }
   0x2   :  { %v25_v3 = vrot.slane %v22_v1, 4  ;;  %v31_v4 = vrot.slane %v23_v2, 4 }
   0x3   :  { %9 = vsyncpa [#allocation7], 0  ;;  %vm258_vm0 = vcmp.lt.s32.totalorder %v16_v0, 256  ;;  %v232_v6 = vmov inf   ;;  %v233_v7 = vmov -inf   ;;  %v44_v17 = vshrl.u32 %v16_v0, 7 }
   0x4   :  { %20 = vst.msk [vmem:[#allocation2] sm:$0x3] %vm258_vm0, %v232_v6  ;;  %21 = vst.msk [vmem:[#allocation3] sm:$0x3] %vm258_vm0, %v233_v7  ;;  %v26_v8 = vmin.f32 %v22_v1, %v25_v3  ;;  %v32_v9 = vmin.f32 %v23_v2, %v31_v4  ;;  %v234_v10 = vmov 1966171168   ;;  %v63_v12 = vmax.f32 %v22_v1, %v25_v3 }
   0x5   :  { %v41_v11 = vunpack.c.l.s4 %v234_v10  ;;  %v69_v13 = vmax.f32 %v23_v2, %v31_v4  ;;  %v101_v43 = vsub.s32 0, %v44_v17  ;;  %v105_v44 = vsub.s32 1, %v44_v17  ;;  %s235_s0 = smov [#allocation4]   ;;  %s236_s15 = smov [#allocation6]  }
   0x6   :  { %v27_v14 = vrot.slane %v26_v8, 2  ;;  %v33_v15 = vrot.slane %v32_v9, 2  ;;  %v64_v16 = vrot.slane %v63_v12, 2  ;;  %vm109_vm1 = vcmask 1040384   ;;  %s157_s13 = sshll.u32 %s235_s0, 4  ;;  %s167_s16 = sshll.u32 %s236_s15, 4  ;;  %s158_s13 = int_to_ptr.vmem [resolvable:$true] %s157_s13  ;;  %s168_s16 = int_to_ptr.vmem [resolvable:$true] %s167_s16 }
   0x7   :  { %v70_v18 = vrot.slane %v69_v13, 2  ;;  %v42_v21 = vunpack.c.0.s8 %v41_v11  ;;  %vm123_vm2 = vcmask 0   ;;  %s188_s17 = scalar_lea.vmem %s158_s13, 16  ;;  %s192_s18 = scalar_lea.vmem %s158_s13, 32 }
   0x8   :  { %v28_v19 = vmin.f32 %v26_v8, %v27_v14  ;;  %v34_v20 = vmin.f32 %v32_v9, %v33_v15  ;;  %v65_v22 = vmax.f32 %v63_v12, %v64_v16  ;;  %p189_p0 = scmp.ne.s32.totalorder %s158_s13, %s188_s17  ;;  %p193_p1 = scmp.lt.s32.totalorder %s158_s13, %s158_s13 }
   0x9   :  { %v71_v23 = vmax.f32 %v69_v13, %v70_v18  ;;  %v45_v30 = vsub.s32 %v42_v21, %v44_v17  ;;  %p194_p2 = scmp.lt.s32.totalorder %s192_s18, %s188_s17 }
   0xa   :  { %v29_v24 = vrot.slane %v28_v19, 1  ;;  %v35_v25 = vrot.slane %v34_v20, 1  ;;  %v66_v26 = vrot.slane %v65_v22, 1 }
   0xb   :  { %v72_v27 = vrot.slane %v71_v23, 1  ;;  %v24_v36 = vld [vmem:[#allocation2] sm:$0x3]  ;;  %v61_v39 = vld [vmem:[#allocation3] sm:$0x3]  ;;  %p195_p3 = por %p194_p2, %p193_p1 }
   0xc   :  { %v30_v28 = vmin.f32 %v28_v19, %v29_v24  ;;  %v36_v29 = vmin.f32 %v34_v20, %v35_v25  ;;  %v67_v31 = vmax.f32 %v65_v22, %v66_v26 }
   0xd   :  { %v73_v32 = vmax.f32 %v71_v23, %v72_v27  ;;  %p196_p4 = pnand %p195_p3, %p189_p0 }
   0xe   :  { %v39_v33 = vcombine.low %v30_v28, %v36_v29 }
   0xf   :  { %v76_v34 = vcombine.low %v67_v31, %v73_v32 }
  0x10   :  { %v46_v35 = vrot.slane %v39_v33, %v45_v30 }
  0x11   :  { %v83_v37 = vrot.slane %v76_v34, %v45_v30 }
  0x12   :  { %v53_v38 = vrot.slane %v46_v35, %v45_v30 }
  0x13   :  { %v90_v40 = vrot.slane %v83_v37, %v45_v30 }
  0x14   :  { %v55_v41 = vmin.f32 %v24_v36, %v53_v38 }
  0x15   :  { %v92_v42 = vmax.f32 %v61_v39, %v90_v40 }
  0x16   :  { %60 = vst.msk [vmem:[#allocation2] sm:$0x3] %vm258_vm0, %v55_v41 }
  0x17   :  { %93 = vst.msk [vmem:[#allocation3] sm:$0x3] %vm258_vm0, %v92_v42 }
  0x1d   :  { %v97_v45 = vld [vmem:[#allocation2] sm:$0x3] }
  0x1e   :  { %v102_v46 = vrot.slane %v97_v45, %v101_v43  ;;  %v106_v47 = vrot.slane %v97_v45, %v105_v44  ;;  %v125_v48 = vld [vmem:[#allocation3] sm:$0x3] }
  0x1f   :  { %v130_v49 = vrot.slane %v125_v48, %v101_v43  ;;  %v134_v50 = vrot.slane %v125_v48, %v105_v44 }
  0x20   :  { %v110_v51 = vsel %vm109_vm1, %v102_v46, inf  ;;  %v111_v52 = vsel %vm109_vm1, %v106_v47, inf }
  0x21   :  { %v112_v53 = vmin.f32 %v110_v51, %v111_v52  ;;  %v137_v54 = vsel %vm109_vm1, %v130_v49, -inf  ;;  %v138_v55 = vsel %vm109_vm1, %v134_v50, -inf }
  0x22   :  { %v139_v56 = vmax.f32 %v137_v54, %v138_v55 }
  0x23   :  { %113 = vmin.xlane.f32.xlu0 %v112_v53 }
  0x27   :  { %140 = vmax.xlane.f32.xlu0 %v139_v56 }
  0xac   :  { %v114_v57 = vpop.xlane.xlu0 %113 }
  0xad   :  { %v115_v58 = vrot.slane %v114_v57, 4 }
  0xaf   :  { %v116_v59 = vmin.f32 %v114_v57, %v115_v58 }
  0xb0   :  { %v141_v60 = vpop.xlane.xlu0 %140 }
  0xb1   :  { %v117_v61 = vrot.slane %v116_v59, 2  ;;  %v142_v62 = vrot.slane %v141_v60, 4 }
  0xb3   :  { %v143_v63 = vmax.f32 %v141_v60, %v142_v62  ;;  %v118_v0 = vmin.f32 %v116_v59, %v117_v61 }
  0xb5   :  { %v144_v1 = vrot.slane %v143_v63, 2  ;;  %v119_v2 = vrot.slane %v118_v0, 1 }
  0xb7   :  { %v145_v3 = vmax.f32 %v143_v63, %v144_v1  ;;  %v120_v4 = vmin.f32 %v118_v0, %v119_v2 }
  0xb9   :  { %179 = vpush %v120_v4  ;;  %v146_v5 = vrot.slane %v145_v3, 1 }
  0xbb   :  { %v147_v6 = vmax.f32 %v145_v3, %v146_v5 }
  0xbd   :  { %181 = vpush %v147_v6 }
  0xea   :  { %s180_s14 = spop %179 }
  0xeb   :  { %v122_v7 = vstv %s180_s14 }
  0xec   :  { %124 = vst.msk [vmem:[#allocation4] sm:$0x1] %vm123_vm2, %v122_v7 }
  0xed   :  { %199 = shalt.err (!%p196_p4)
}
  0xee   :  { %160 = dma.vmem_to_hbm [thread:$0]  %s158_s13, 16, %s279_s1, [#allocation5]  }
  0xef   :  { %s182_s21 = spop %181  ;;  %s208_s22 = scalar_lea.vmem %s168_s16, 16 }
  0xf0   :  { %v149_v8 = vstv %s182_s21  ;;  %p209_p5 = scmp.ne.s32.totalorder %s168_s16, %s208_s22  ;;  %s212_s23 = scalar_lea.vmem %s168_s16, 32 }
  0xf1   :  { %150 = vst.msk [vmem:[#allocation6] sm:$0x1] %vm123_vm2, %v149_v8  ;;  %p213_p6 = scmp.lt.s32.totalorder %s168_s16, %s168_s16  ;;  %p214_p7 = scmp.lt.s32.totalorder %s212_s23, %s208_s22 }
  0xf3   :  { %p215_p8 = por %p214_p7, %p213_p6 }
  0xf5   :  { %p216_p9 = pnand %p215_p8, %p209_p5 }
  0xf7   :  { %219 = shalt.err (!%p216_p9)
}
  0xf8   :  { %170 = dma.vmem_to_hbm [thread:$0]  %s168_s16, 16, %s280_s2, [#allocation7]  }
  0xf9   :  { %228 = dma.done.wait [#allocation5], 16  }
  0xfa   :  { %229 = vsyncadd [#allocation5], 4294967280 }
  0xfb   :  { %230 = dma.done.wait [#allocation7], 16  }
  0xfc   :  { %231 = vsyncadd [#allocation7], 4294967280 }
  0xfd   :  { %177 = vsyncpa [#allocation5], 1 }
  0xfe   :  { %178 = vsyncpa [#allocation7], 1 }

// kernel: dym_activation_fake_quantize.3
= control target key start
LH: loop header
LB: loop body
LE: loop exit
PB: predicated region body
PF: predicated region fallthrough
CT: control target
= control target key end

     0   :  { %7 = vsyncpa [#allocation3], 0  ;;  %s117_s0 = inlined_call_operand.vmem [shape: f32[3], index: 0, kind: input, shape index: {}]   ;;  %s118_s1 = inlined_call_operand.vmem [shape: f32[8,256], index: 1, kind: input, shape index: {}]   ;;  %s119_s2 = inlined_call_operand.vmem [shape: f32[8,256], index: 2, kind: output, shape index: {}]  }
   0x1   :  { %s14_s11 = sshll.u32 %s117_s0, 4  ;;  %s15_s11 = int_to_ptr.vmem [resolvable:$true] %s14_s11 }
   0x2   :  { %s72_s12 = scalar_lea.vmem %s15_s11, 16  ;;  %p77_p1 = scmp.lt.s32.totalorder %s15_s11, %s15_s11 }
   0x3   :  { %p73_p0 = scmp.ne.s32.totalorder %s15_s11, %s72_s12  ;;  %p78_p2 = scmp.lt.s32.totalorder %s72_s12, %s72_s12 }
   0x5   :  { %p79_p3 = por %p78_p2, %p77_p1 }
   0x7   :  { %p80_p4 = pnand %p79_p3, %p73_p0 }
   0x9   :  { %83 = shalt.err (!%p80_p4)
}
   0xa   :  { %s86_s13 = smov [#allocation2]  }
   0xb   :  { %17 = dma.vmem_to_smem %s15_s11, 16, %s86_s13, [#allocation3]  }
   0xc   :  { %84 = dma.done.wait [#allocation3], 16  }
   0xd   :  { %85 = vsyncadd [#allocation3], 4294967280 }
   0xe   :  { %23 = sfence }
   0xf   :  { %s53_s14 = sld [smem:[#allocation2 + $0x1]]  ;;  %v27_v0 = vld [vmem:[%s118_s1] sm:$0xff]  ;;  %v28_v1 = vld [vmem:[%s118_s1 + $0x8] sm:$0xff] }
  0x10   :  { %s54_s15 = sld [smem:[#allocation2 + $0x2]] }
  0x11   :  { %s24_s19 = sld [smem:[#allocation2]] }
  0x15   :  { %v29_v2 = vstv %s53_s14 }
  0x16   :  { %v30_v3 = vmul.f32 %v29_v2, %v27_v0  ;;  %v31_v4 = vmul.f32 %v29_v2, %v28_v1  ;;  %v32_v5 = vstv %s54_s15 }
  0x17   :  { %v43_v25 = vstv %s24_s19 }
  0x18   :  { %v33_v6 = vadd.f32 %v32_v5, %v30_v3  ;;  %v34_v7 = vadd.f32 %v32_v5, %v31_v4 }
  0x1a   :  { %v57_v8 = vcvt.f32.s32 %v33_v6  ;;  %v55_v9 = vand.u32 2147483647, %v33_v6  ;;  %v65_v10 = vcvt.f32.s32 %v34_v7  ;;  %v60_v12 = vand.u32 2147483648, %v33_v6 }
  0x1b   :  { %v63_v13 = vand.u32 2147483647, %v34_v7  ;;  %v68_v15 = vand.u32 2147483648, %v34_v7 }
  0x1c   :  { %v58_v11 = vcvt.s32.f32 %v57_v8  ;;  %v66_v14 = vcvt.s32.f32 %v65_v10  ;;  %vm56_vm0 = vcmp.lt.f32.partialorder %v55_v9, 8388608.0 }
  0x1d   :  { %vm64_vm1 = vcmp.lt.f32.partialorder %v63_v13, 8388608.0 }
  0x1e   :  { %v59_v16 = vand.u32 2147483647, %v58_v11  ;;  %v67_v17 = vand.u32 2147483647, %v66_v14 }
  0x20   :  { %v61_v18 = vor.u32 %v60_v12, %v59_v16  ;;  %v69_v19 = vor.u32 %v68_v15, %v67_v17 }
  0x22   :  { %v62_v20 = vsel %vm56_vm0, %v61_v18, %v33_v6  ;;  %v70_v22 = vsel %vm64_vm1, %v69_v19, %v34_v7 }
  0x23   :  { %v37_v21 = vmax.f32 %v62_v20, 0.0  ;;  %v38_v23 = vmax.f32 %v70_v22, 0.0 }
  0x25   :  { %v39_v24 = vmin.f32 %v37_v21, 255.0  ;;  %v40_v26 = vmin.f32 %v38_v23, 255.0 }
  0x27   :  { %v41_v27 = vsub.f32 %v39_v24, %v32_v5  ;;  %v42_v28 = vsub.f32 %v40_v26, %v32_v5 }
  0x29   :  { %v44_v29 = vmul.f32 %v43_v25, %v41_v27  ;;  %v45_v30 = vmul.f32 %v43_v25, %v42_v28 }
  0x2b   :  { %46 = vst [vmem:[%s119_s2] sm:$0xff] %v44_v29  ;;  %47 = vst [vmem:[%s119_s2 + $0x8] sm:$0xff] %v45_v30 }
  0x2c   :  { %52 = vsyncpa [#allocation3], 1 }

</bundles_post_ra>
